<compile_context>
chip_gen: v7x
topology: tpu7x:2x2x1
jax: 0.10.0
libtpu: 0.0.40
codegen_flags: <defaults>
</compile_context>

<pallas_src>
import functools

import jax
import jax.numpy as jnp
from jax.experimental import pallas as pl
from jax.experimental.pallas import tpu as pltpu

EPSILON = 1e-6


# ---------------------------------------------------------------------------
# Stage 1: K-hop diffusion, writes concatenated hop features (torch `cat` order).
# ---------------------------------------------------------------------------
def _diffusion_kernel(x_ref, supp_ref, xcat_ref, *, order, include_self):
    """x_ref: (C, V, TL) | supp_ref: (S, V, V) | xcat_ref: (C_total, V, TL)."""
    c_in, v, _ = x_ref.shape
    n_supports = supp_ref.shape[0]
    cdt = xcat_ref.dtype                                   # compute dtype (bf16 / f32)

    x0 = x_ref[...].astype(cdt)                            # (C, V, TL)
    blk = 0
    if include_self:
        xcat_ref[0:c_in] = x0                              # channel block 0 = x itself
        blk = 1

    for s in range(n_supports):
        a = supp_ref[s]                                    # (V, V)
        # Hoist the broadcast once per support (broadcasts are not CSE'd).
        a_b = jnp.broadcast_to(a[None, :, :], (c_in, v, v))
        xk = x0
        for _ in range(order):
            # x_k[c, w, l] = sum_v A[w, v] * x_{k-1}[c, v, l]
            #   == torch.einsum('ncvl,wv->ncwl') for this (n, l-tile) slab.
            # Batched (over channels) MXU matmul, f32 accumulation.
            xk = jnp.einsum('cwv,cvl->cwl', a_b, xk,
                            preferred_element_type=jnp.float32).astype(cdt)
            xcat_ref[blk * c_in:(blk + 1) * c_in] = xk
            blk += 1


# ---------------------------------------------------------------------------
# Stage 2: fused 1x1 conv — single deep matmul over C_total per lane-dense chunk.
# ---------------------------------------------------------------------------
def _mixing_kernel(xcat_ref, w_ref, b_ref, o_ref):
    """xcat_ref: (C_total, TF) | w_ref: (c_out, C_total) | b_ref: (c_out, 1) | o_ref: (c_out, TF)."""
    y = jnp.dot(w_ref[...], xcat_ref[...],
                preferred_element_type=jnp.float32)        # (c_out, TF), f32 accum
    o_ref[...] = (y + b_ref[...]).astype(o_ref.dtype)


def _pick_tile(dim, target):
    """Largest tile <= target dividing `dim`, preferring multiples of 128 (lane-dense)."""
    if dim <= target:
        return dim
    cand = (target // 128) * 128
    while cand >= 128:
        if dim % cand == 0:
            return cand
        cand -= 128
    for cand in range(target, 0, -1):
        if dim % cand == 0:
            return cand
    return dim


def spatial_conv_order_k(x, supports, weight, bias, *, order=2, include_self=True,
                         compute_dtype=jnp.bfloat16, time_tile=512, feat_tile=2048):
    """Pallas implementation of SpatialConvOrderK.forward.

    x       : (N, C, V, L) or (N, C, V)   (PyTorch NCHW convention)
    supports: list of (V, V) arrays
    weight  : (c_out, C_total)  == nn.Conv2d(C_total, c_out, 1) weight squeezed
    bias    : (c_out,)
    """
    squeeze = False
    if x.ndim < 4:
        x = x[..., None]
        squeeze = True
    N, C, V, L = x.shape

    if not isinstance(supports, (list, tuple)):
        supports = [supports]
    S = len(supports)
    supp = jnp.stack([jnp.asarray(a) for a in supports], axis=0).astype(compute_dtype)

    c_out, c_total = weight.shape
    n_blocks = order * S + (1 if include_self else 0)
    assert c_total == n_blocks * C, \
        "weight input channels inconsistent with supports / order / include_self"

    compiler_params = pltpu.CompilerParams(
        dimension_semantics=("parallel", "parallel"),
        vmem_limit_bytes=32 * 1024 * 1024,   # well above the per-step working set on all gens
    )

    # ---- Stage 1: diffusion -> (N, C_total, V, L) hop features (native NCVL, no transpose)
    TL = _pick_tile(L, time_tile)
    diff_kernel = functools.partial(_diffusion_kernel, order=order,
                                    include_self=include_self)
    xcat = pl.pallas_call(
        diff_kernel,
        out_shape=jax.ShapeDtypeStruct((N, c_total, V, L), compute_dtype),
        grid=(N, L // TL),
        in_specs=[
            pl.BlockSpec((None, C, V, TL), lambda n, t: (n, 0, 0, t)),
            pl.BlockSpec((S, V, V), lambda n, t: (0, 0, 0)),
        ],
        out_specs=pl.BlockSpec((None, c_total, V, TL), lambda n, t: (n, 0, 0, t)),
        compiler_params=compiler_params,
    )(x, supp)

    # ---- Stage 2: 1x1 conv as one deep matmul over C_total per lane-dense chunk of V*L.
    # Both reshapes below collapse/expand contiguous trailing dims -> free (no HBM copy).
    F = V * L
    TF = _pick_tile(F, feat_tile)
    xcat_2d = xcat.reshape(N, c_total, F)
    w_c = weight.astype(compute_dtype)
    b_col = bias.reshape(c_out, 1).astype(jnp.float32)

    out_2d = pl.pallas_call(
        _mixing_kernel,
        out_shape=jax.ShapeDtypeStruct((N, c_out, F), x.dtype),
        grid=(N, F // TF),
        in_specs=[
            pl.BlockSpec((None, c_total, TF), lambda n, f: (n, 0, f)),
            pl.BlockSpec((c_out, c_total), lambda n, f: (0, 0)),
            pl.BlockSpec((c_out, 1), lambda n, f: (0, 0)),
        ],
        out_specs=pl.BlockSpec((None, c_out, TF), lambda n, f: (n, 0, f)),
        compiler_params=compiler_params,
    )(xcat_2d, w_c, b_col)

    out = out_2d.reshape(N, c_out, V, L)
    if squeeze:
        out = out[..., 0]
    return out


def compute_support(adj):
    """JAX port of SpatialConvOrderK.compute_support."""
    adj_bwd = adj.T
    adj_fwd = adj / (adj.sum(1, keepdims=True) + EPSILON)
    adj_bwd = adj_bwd / (adj_bwd.sum(1, keepdims=True) + EPSILON)
    return [adj_fwd, adj_bwd]


def _reference_forward(x, supports, weight, bias, *, order=2, include_self=True):
    """Pure-JAX reference mirroring the PyTorch forward (for verification)."""
    squeeze = False
    if x.ndim < 4:
        x = x[..., None]
        squeeze = True
    out = [x] if include_self else []
    for a in supports:
        x1 = jnp.einsum('ncvl,wv->ncwl', x, a)
        out.append(x1)
        for _ in range(2, order + 1):
            x1 = jnp.einsum('ncvl,wv->ncwl', x1, a)
            out.append(x1)
    cat = jnp.concatenate(out, axis=1)
    y = jnp.einsum('ncvl,oc->novl', cat, weight) + bias[None, :, None, None]
    if squeeze:
        y = y[..., 0]
    return y


if __name__ == "__main__":
    # Small, module-consistent shapes: batch=2, c_in=4, nodes=16, seq=128 (lane-dense),
    # c_out=8, support_len=2 (fwd + bwd random-walk supports), order=2.
    N, C, V, L = 2, 4, 16, 128
    C_OUT, ORDER, SUPPORT_LEN = 8, 2, 2
    C_TOTAL = (ORDER * SUPPORT_LEN + 1) * C   # include_self=True

    key = jax.random.PRNGKey(0)
    kx, ka, kw, kb = jax.random.split(key, 4)

    x = jax.random.normal(kx, (N, C, V, L), dtype=jnp.float32)
    adj = jax.random.uniform(ka, (V, V), dtype=jnp.float32)
    adj = adj * (adj > 0.5)                                   # sparse-ish adjacency
    supports = compute_support(adj)

    # Deterministic synthetic parameters (shapes from nn.Conv2d(C_TOTAL, C_OUT, 1)).
    weight = 0.1 * jax.random.normal(kw, (C_OUT, C_TOTAL), dtype=jnp.float32)
    bias = 0.1 * jax.random.normal(kb, (C_OUT,), dtype=jnp.float32)

    ref = _reference_forward(x, supports, weight, bias, order=ORDER, include_self=True)

    # Exact-semantics check: f32 compute path.
    out_f32 = jax.block_until_ready(spatial_conv_order_k(
        x, supports, weight, bias, order=ORDER, include_self=True,
        compute_dtype=jnp.float32))
    assert out_f32.shape == (N, C_OUT, V, L), out_f32.shape
    assert jnp.allclose(out_f32, ref, rtol=1e-4, atol=1e-4), \
        f"f32 max abs err {jnp.max(jnp.abs(out_f32 - ref))}"

    # Default perf path: bf16 MXU inputs, f32 accumulation (input-rounding error only).
    out_bf16 = jax.block_until_ready(spatial_conv_order_k(
        x, supports, weight, bias, order=ORDER, include_self=True))
    assert out_bf16.shape == (N, C_OUT, V, L), out_bf16.shape
    assert jnp.allclose(out_bf16, ref, rtol=3e-2, atol=3e-2), \
        f"bf16 max abs err {jnp.max(jnp.abs(out_bf16 - ref))}"

    print("KERNEL_OK")
</pallas_src>

<mosaic_0001>
module attributes {stable_mosaic.version = 11 : i64} {
  func.func @_diffusion_kernel(%arg0: i32, %arg1: i32, %arg2: memref<1x4x16x128xf32, #tpu.memory_space<vmem>>, %arg3: memref<2x16x16xf32, #tpu.memory_space<vmem>>, %arg4: memref<1x20x16x128xf32, #tpu.memory_space<vmem>>) attributes {dimension_semantics = [#tpu.dimension_semantics<parallel>, #tpu.dimension_semantics<parallel>], iteration_bounds = array<i64: 2, 1>, scalar_prefetch = 0 : i64, scratch_operands = 0 : i64, tpu.core_type = #tpu.core_type<tc>, window_params = [{transform_indices = @transform_0, window_bounds = array<i64: 1, 4, 16, 128>}, {pipeline_mode = #tpu.pipeline_mode<synchronous>, transform_indices = @transform_1, window_bounds = array<i64: 2, 16, 16>}, {transform_indices = @transform_2, window_bounds = array<i64: 1, 20, 16, 128>}]} {
    %c0 = arith.constant 0 : index
    %c0_0 = arith.constant 0 : index
    %c0_1 = arith.constant 0 : index
    %c0_2 = arith.constant 0 : index
    %0 = vector.load %arg2[%c0, %c0_0, %c0_1, %c0_2] : memref<1x4x16x128xf32, #tpu.memory_space<vmem>>, vector<1x4x16x128xf32>
    %1 = vector.shape_cast %0 : vector<1x4x16x128xf32> to vector<4x16x128xf32>
    %c0_3 = arith.constant 0 : index
    %c0_4 = arith.constant 0 : index
    %c0_5 = arith.constant 0 : index
    %c0_6 = arith.constant 0 : index
    %2 = vector.load %arg4[%c0_3, %c0_4, %c0_5, %c0_6] : memref<1x20x16x128xf32, #tpu.memory_space<vmem>>, vector<1x4x16x128xf32>
    %3 = vector.shape_cast %2 : vector<1x4x16x128xf32> to vector<4x16x128xf32>
    %4 = vector.shape_cast %1 : vector<4x16x128xf32> to vector<1x4x16x128xf32>
    tpu.vector_store %arg4[%c0_3, %c0_4, %c0_5, %c0_6], %4 {strides = array<i32>} : memref<1x20x16x128xf32, #tpu.memory_space<vmem>>, vector<1x4x16x128xf32>,
    %c0_7 = arith.constant 0 : index
    %c0_8 = arith.constant 0 : index
    %c0_9 = arith.constant 0 : index
    %5 = vector.load %arg3[%c0_7, %c0_8, %c0_9] : memref<2x16x16xf32, #tpu.memory_space<vmem>>, vector<1x16x16xf32>
    %6 = vector.shape_cast %5 : vector<1x16x16xf32> to vector<16x16xf32>
    %7 = vector.shape_cast %6 : vector<16x16xf32> to vector<1x16x16xf32>
    %8 = vector.shape_cast %7 : vector<1x16x16xf32> to vector<1x16x16xf32>
    %9 = vector.broadcast %8 : vector<1x16x16xf32> to vector<4x16x16xf32>
    "tpu.trace_start"() <{level = 10 : i32, message = "cwv,cvl->cwl"}> : () -> ()
    %cst = arith.constant dense<0.000000e+00> : vector<4x16x128xf32>
    %10 = tpu.matmul %9, %1, %cst {dimension_numbers = #tpu.dot_dimension_numbers<[2], [1], [1], [2], [0, 0, 0, 1, 1, 2], [0], [0]>} : vector<4x16x16xf32>, vector<4x16x128xf32>, vector<4x16x128xf32> -> vector<4x16x128xf32>
    "tpu.trace_stop"() : () -> ()
    %c0_10 = arith.constant 0 : index
    %c4 = arith.constant 4 : index
    %c0_11 = arith.constant 0 : index
    %c0_12 = arith.constant 0 : index
    %11 = vector.load %arg4[%c0_10, %c4, %c0_11, %c0_12] : memref<1x20x16x128xf32, #tpu.memory_space<vmem>>, vector<1x4x16x128xf32>
    %12 = vector.shape_cast %11 : vector<1x4x16x128xf32> to vector<4x16x128xf32>
    %13 = vector.shape_cast %10 : vector<4x16x128xf32> to vector<1x4x16x128xf32>
    tpu.vector_store %arg4[%c0_10, %c4, %c0_11, %c0_12], %13 {strides = array<i32>} : memref<1x20x16x128xf32, #tpu.memory_space<vmem>>, vector<1x4x16x128xf32>,
    "tpu.trace_start"() <{level = 10 : i32, message = "cwv,cvl->cwl"}> : () -> ()
    %cst_13 = arith.constant dense<0.000000e+00> : vector<4x16x128xf32>
    %14 = tpu.matmul %9, %10, %cst_13 {dimension_numbers = #tpu.dot_dimension_numbers<[2], [1], [1], [2], [0, 0, 0, 1, 1, 2], [0], [0]>} : vector<4x16x16xf32>, vector<4x16x128xf32>, vector<4x16x128xf32> -> vector<4x16x128xf32>
    "tpu.trace_stop"() : () -> ()
    %c0_14 = arith.constant 0 : index
    %c8 = arith.constant 8 : index
    %c0_15 = arith.constant 0 : index
    %c0_16 = arith.constant 0 : index
    %15 = vector.load %arg4[%c0_14, %c8, %c0_15, %c0_16] : memref<1x20x16x128xf32, #tpu.memory_space<vmem>>, vector<1x4x16x128xf32>
    %16 = vector.shape_cast %15 : vector<1x4x16x128xf32> to vector<4x16x128xf32>
    %17 = vector.shape_cast %14 : vector<4x16x128xf32> to vector<1x4x16x128xf32>
    tpu.vector_store %arg4[%c0_14, %c8, %c0_15, %c0_16], %17 {strides = array<i32>} : memref<1x20x16x128xf32, #tpu.memory_space<vmem>>, vector<1x4x16x128xf32>,
    %c1 = arith.constant 1 : index
    %c0_17 = arith.constant 0 : index
    %c0_18 = arith.constant 0 : index
    %18 = vector.load %arg3[%c1, %c0_17, %c0_18] : memref<2x16x16xf32, #tpu.memory_space<vmem>>, vector<1x16x16xf32>
    %19 = vector.shape_cast %18 : vector<1x16x16xf32> to vector<16x16xf32>
    %20 = vector.shape_cast %19 : vector<16x16xf32> to vector<1x16x16xf32>
    %21 = vector.shape_cast %20 : vector<1x16x16xf32> to vector<1x16x16xf32>
    %22 = vector.broadcast %21 : vector<1x16x16xf32> to vector<4x16x16xf32>
    "tpu.trace_start"() <{level = 10 : i32, message = "cwv,cvl->cwl"}> : () -> ()
    %cst_19 = arith.constant dense<0.000000e+00> : vector<4x16x128xf32>
    %23 = tpu.matmul %22, %1, %cst_19 {dimension_numbers = #tpu.dot_dimension_numbers<[2], [1], [1], [2], [0, 0, 0, 1, 1, 2], [0], [0]>} : vector<4x16x16xf32>, vector<4x16x128xf32>, vector<4x16x128xf32> -> vector<4x16x128xf32>
    "tpu.trace_stop"() : () -> ()
    %c0_20 = arith.constant 0 : index
    %c12 = arith.constant 12 : index
    %c0_21 = arith.constant 0 : index
    %c0_22 = arith.constant 0 : index
    %24 = vector.load %arg4[%c0_20, %c12, %c0_21, %c0_22] : memref<1x20x16x128xf32, #tpu.memory_space<vmem>>, vector<1x4x16x128xf32>
    %25 = vector.shape_cast %24 : vector<1x4x16x128xf32> to vector<4x16x128xf32>
    %26 = vector.shape_cast %23 : vector<4x16x128xf32> to vector<1x4x16x128xf32>
    tpu.vector_store %arg4[%c0_20, %c12, %c0_21, %c0_22], %26 {strides = array<i32>} : memref<1x20x16x128xf32, #tpu.memory_space<vmem>>, vector<1x4x16x128xf32>,
    "tpu.trace_start"() <{level = 10 : i32, message = "cwv,cvl->cwl"}> : () -> ()
    %cst_23 = arith.constant dense<0.000000e+00> : vector<4x16x128xf32>
    %27 = tpu.matmul %22, %23, %cst_23 {dimension_numbers = #tpu.dot_dimension_numbers<[2], [1], [1], [2], [0, 0, 0, 1, 1, 2], [0], [0]>} : vector<4x16x16xf32>, vector<4x16x128xf32>, vector<4x16x128xf32> -> vector<4x16x128xf32>
    "tpu.trace_stop"() : () -> ()
    %c0_24 = arith.constant 0 : index
    %c16 = arith.constant 16 : index
    %c0_25 = arith.constant 0 : index
    %c0_26 = arith.constant 0 : index
    %28 = vector.load %arg4[%c0_24, %c16, %c0_25, %c0_26] : memref<1x20x16x128xf32, #tpu.memory_space<vmem>>, vector<1x4x16x128xf32>
    %29 = vector.shape_cast %28 : vector<1x4x16x128xf32> to vector<4x16x128xf32>
    %30 = vector.shape_cast %27 : vector<4x16x128xf32> to vector<1x4x16x128xf32>
    tpu.vector_store %arg4[%c0_24, %c16, %c0_25, %c0_26], %30 {strides = array<i32>} : memref<1x20x16x128xf32, #tpu.memory_space<vmem>>, vector<1x4x16x128xf32>,
    return
  }
  func.func @transform_0(%arg0: i32, %arg1: i32) -> (i32, i32, i32, i32) {
    %c0_i32 = arith.constant 0 : i32
    %c0_i32_0 = arith.constant 0 : i32
    %c0_i32_1 = arith.constant 0 : i32
    return %arg0, %c0_i32, %c0_i32_0, %arg1 : i32, i32, i32, i32
  }
  func.func @transform_1(%arg0: i32, %arg1: i32) -> (i32, i32, i32) {
    %c0_i32 = arith.constant 0 : i32
    %c0_i32_0 = arith.constant 0 : i32
    %c0_i32_1 = arith.constant 0 : i32
    %c0_i32_2 = arith.constant 0 : i32
    return %c0_i32, %c0_i32_0, %c0_i32_1 : i32, i32, i32
  }
  func.func @transform_2(%arg0: i32, %arg1: i32) -> (i32, i32, i32, i32) {
    %c0_i32 = arith.constant 0 : i32
    %c0_i32_0 = arith.constant 0 : i32
    %c0_i32_1 = arith.constant 0 : i32
    return %arg0, %c0_i32, %c0_i32_0, %arg1 : i32, i32, i32, i32
  }
}

</mosaic_0001>

<bundles_post_ra>
// kernel: tpu_custom_call.1
= control target key start
LH: loop header
LB: loop body
LE: loop exit
PB: predicated region body
PF: predicated region fallthrough
CT: control target
= control target key end

     0   :  { %7 = vsyncpa [#allocation3], 0  ;;  %s2489_s0 = inlined_call_operand.hbm [shape: f32[2,4,16,128], index: 0, kind: input, shape index: {}]   ;;  %s2490_s1 = inlined_call_operand.hbm [shape: f32[2,16,16], index: 1, kind: input, shape index: {}]   ;;  %s2491_s2 = inlined_call_operand.hbm [shape: f32[2,20,16,128], index: 2, kind: output, shape index: {}]  }
   0x1   :  { %9 = vsyncpa [#allocation3 + $0x1], 0 }
   0x2   :  { %10 = vsyncpa [#allocation6], 0 }
   0x3   :  { %11 = vsyncpa [#allocation4], 0 }
   0x4   :  { %13 = vsyncpa [#allocation4 + $0x1], 0  ;;  %s2140_s9 = smov 0   ;;  %s2142_s10 = smov 0  }
   0x5   :  { %s2144_s11 = smov 0   ;;  %s2146_s12 = smov 0  }
   0x6   :  { %s2148_s13 = smov 0   ;;  %s2150_s14 = smov 0  }
   0x7 LB: > { %s1574_s15 = sadd.s32 4294967295, %s2116_s14   ;;  %s1575_s16 = sadd.s32 4294967294, %s2116_s14   ;;  %s2116_s14 = sphi %s2150_s14, %s19_s14   ;;  %s2112_s13 = sphi %s2148_s13, %s2515_s13   ;;  %s2108_s12 = sphi %s2146_s12, %s2514_s12   ;;  %s2104_s11 = sphi %s2144_s11, %s2513_s11   ;;  %s2100_s10 = sphi %s2142_s10, %s2512_s10   ;;  %s2096_s9 = sphi %s2140_s9, %s2511_s9  }
   0x8   : > { %p53_p0 = scmp.ne.s32.totalorder %s2100_s10, %s2096_s9  ;;  %p2174_p1 = scmp.eq.s32.totalorder %s1574_s15, 0 }
   0x9   : > { %p2178_p2 = scmp.eq.s32.totalorder %s1574_s15, 1  ;;  %p106_p3 = scmp.eq.s32.totalorder %s1575_s16, 1 }
   0xa   : > { %s2496_s17 = scalar_select %p2174_p1, 1, 0 }
   0xb   : > { %s2497_s18 = scalar_select %p2178_p2, 1, 0 }
   0xc   : > { %p2184_p4 = por %p2174_p1, %p53_p0  ;;  %p1576_p5 = scmp.ge.s32.totalorder %s2116_s14, 1 }
   0xd   : > { %p2189_p6 = por %p106_p3, %p53_p0  ;;  %p113_p7 = scmp.lt.s32.totalorder %s2116_s14, 3 }
   0xe   : > { %s2498_s19 = scalar_select %p2184_p4, 1, 0 }
   0xf   : > { %s2499_s20 = scalar_select %p2189_p6, 1, 0 }
  0x10   : > { %p2194_p8 = pnand %p1576_p5, %p113_p7  ;;  %s2118_s22 = smov [#allocation5]  }
  0x11   : > { %s125_s23 = sshll.u32 %s2118_s22, 4  ;;  %s31_s25 = sadd.s32 1, %s2112_s13  ;;  %s126_s23 = int_to_ptr.vmem [resolvable:$true] %s125_s23 }
  0x12   : > { %s2500_s21 = scalar_select %p2194_p8, 1, 0 }
  0x13   : > { %p1903_p9 = pneg %p2194_p8  ;;  %s1972_s28 = scalar_lea.hbm %s2490_s1, 512 }
  0x14   : > { %p1973_p12 = scmp.ne.s32.totalorder %s2490_s1, %s1972_s28  ;;  %p1979_p5 = scmp.lt.u32.totalorder %s1972_s28, %s2490_s1 }
  0x15   : > { %p2203_p11 = pnand %p1903_p9, %p2174_p1 }
  0x17   : > { %p1974_p13 = pneg %p2203_p11 }
  0x19   : > { %p1975_p0 = pnand %p1974_p13, %p1973_p12 }
  0x1b   : > { %p1976_p3 = pneg %p1975_p0 }
  0x1d   : > { %p1981_p7 = pnand %p1979_p5, %p1976_p3 }
  0x1f   : > { %1984 = shalt.err (!%p1981_p7)
}
  0x20   : > { %s1985_s5 = scalar_lea.vmem %s126_s23, 512  ;;  %p1993_p1 = scmp.lt.s32.totalorder %s126_s23, %s126_s23 }
  0x21   : > { %p1986_p9 = scmp.ne.s32.totalorder %s126_s23, %s1985_s5  ;;  %p1994_p4 = scmp.lt.s32.totalorder %s1985_s5, %s1985_s5 }
  0x23   : > { %p1988_p10 = pnand %p1986_p9, %p1974_p13  ;;  %p1995_p8 = por %p1994_p4, %p1993_p1 }
  0x25   : > { %p1989_p6 = pneg %p1988_p10 }
  0x27   : > { %p1996_p2 = pnand %p1995_p8, %p1989_p6 }
  0x29   : > { %1999 = shalt.err (!%p1996_p2)
}
  0x2a   : > { %s2119_s6 = smov 128   ;;  %s2120_s7 = smov 8  }
  0x2b   : > { %1906 = dma.hbm_to_vmem [thread:$0]  (!%p2203_p11), %s2490_s1, 512, %s126_s23, [#allocation6], %s2119_s6, %s2119_s6, %s2120_s7  }
  0x2c   : > { %p33_p1 = scmp.ge.s32.totalorder %s31_s25, 2  ;;  %s40_s16 = sadd.s32 1, %s2104_s11 }
  0x2d   : > { %p47_p2 = scmp.ne.s32.totalorder %s2104_s11, %s2100_s10  ;;  %p48_p4 = scmp.eq.s32.totalorder %s2116_s14, 0 }
  0x2e   : > { %s2517_s25 = smov (%p33_p1, %s31_s25), 0  ;;  %p2503_p8 = scmp.ne.s32.totalorder %s2497_s18, 0 }
  0x2f   : > { %p2233_p6 = por %p48_p4, %p47_p2  ;;  %s35_s26 = ssub.s32 %s2112_s13, %s2517_s25 }
  0x30   : > { %p2239_p10 = por %p2503_p8, %p47_p2  ;;  %p1916_p12 = scmp.lt.s32.totalorder %s2116_s14, 2 }
  0x31   : > { %p38_p11 = scmp.eq.s32.totalorder %s35_s26, 0  ;;  %s139_s23 = sand.u32 1, %s2104_s11  }
  0x32   : > { %s1579_s27 = sshll.u32 %s139_s23, 6  ;;  %s1652_s29 = sshll.u32 %s2112_s13, 10 }
  0x33   : > { %s2248_s28 = scalar_select %p38_p11, %s2104_s11, %s40_s16  }
  0x34   : > { %s2254_s4 = scalar_lea.hbm %s2489_s0, %s1652_s29  ;;  %s143_s18 = scalar_lea.vmem [#allocation2], %s1579_s27 }
  0x35   : > { %s151_s5 = sshll.u32 %s143_s18, 4  ;;  %p2260_p13 = pnand %p1916_p12, %p2233_p6  ;;  %s2256_s5 = int_to_ptr.vmem [resolvable:$true] %s151_s5 }
  0x36   : > { %s2264_s15 = scalar_lea.sflag [#allocation3], %s139_s23  ;;  %s2000_s16 = scalar_lea.hbm %s2254_s4, 1024 }
  0x37   : > { %p2001_p0 = scmp.ne.s32.totalorder %s2254_s4, %s2000_s16  ;;  %p2002_p3 = pneg %p2260_p13 }
  0x38   : > { %s2005_s22 = scalar_lea.hbm %s2489_s0, 2048  ;;  %p2006_p9 = scmp.lt.u32.totalorder %s2254_s4, %s2489_s0 }
  0x39   : > { %p2003_p5 = pnand %p2002_p3, %p2001_p0  ;;  %p2007_p1 = scmp.lt.u32.totalorder %s2005_s22, %s2000_s16 }
  0x3a   : > { %p2009_p4 = scmp.lt.u32.totalorder %s2000_s16, %s2254_s4 }
  0x3b   : > { %p2004_p7 = pneg %p2003_p5  ;;  %p2008_p2 = por %p2007_p1, %p2006_p9 }
  0x3d   : > { %p2010_p6 = por %p2009_p4, %p2008_p2 }
  0x3f   : > { %p2011_p8 = pnand %p2010_p6, %p2004_p7 }
  0x41   : > { %2014 = shalt.err (!%p2011_p8)
}
  0x42   : > { %s2015_s23 = scalar_lea.vmem %s2256_s5, 1024  ;;  %s2121_s3 = smov [#allocation2]  }
  0x43   : > { %p2016_p12 = scmp.ne.s32.totalorder %s2256_s5, %s2015_s23  ;;  %s2020_s18 = sshll.u32 %s2121_s3, 4  ;;  %s2021_s18 = int_to_ptr.vmem [resolvable:$false] %s2020_s18 }
  0x44   : > { %s2022_s26 = scalar_lea.vmem %s2021_s18, 2048  ;;  %p2023_p5 = scmp.lt.s32.totalorder %s2256_s5, %s2021_s18 }
  0x45   : > { %p2018_p11 = pnand %p2016_p12, %p2002_p3  ;;  %p2024_p9 = scmp.lt.s32.totalorder %s2022_s26, %s2015_s23 }
  0x47   : > { %p2019_p0 = pneg %p2018_p11  ;;  %p2025_p1 = por %p2024_p9, %p2023_p5 }
  0x49   : > { %p2026_p2 = pnand %p2025_p1, %p2019_p0 }
  0x4b   : > { %2029 = shalt.err (!%p2026_p2)
}
  0x4c   : > { %1910 = dma.hbm_to_vmem [thread:$0]  (!%p2260_p13), %s2254_s4, 1024, %s2256_s5, %s2264_s15, %s2119_s6, %s2119_s6, %s2120_s7  }
  0x4d   : > { %p2506_p3 = scmp.ne.s32.totalorder %s2500_s21, 0 }
  0x4e   : > { %s2298_s16 = sand.u32 (!%p2506_p3), 1, %s2100_s10   ;;  %p2507_p7 = scmp.ne.s32.totalorder (!%p2506_p3), %s2498_s19, 0 }
  0x4f   : > { %163 = sbr.rel (%p2506_p3) target bundleno = 777 (0x309), region = 28  ;;  %s1583_s27 = sshll.u32 (!%p2506_p3), %s2298_s16, 6 }
  0x50   : > { %s166_s22 = scalar_lea.sflag (!%p2506_p3), [#allocation3], %s2298_s16  ;;  %s169_s29 = scalar_lea.vmem (!%p2506_p3), [#allocation2], %s1583_s27 }
  0x56   : > { %2083 = dma.done.wait (%p2507_p7), %s166_s22, 1024  }
  0x57   : > { %2085 = vsyncadd (%p2507_p7), %s166_s22, 4294966272  ;;  %p2508_p4 = scmp.ne.s32.totalorder %s2496_s17, 0 }
  0x59   : > { %2087 = dma.done.wait (%p2508_p4), [#allocation6], 512  }
  0x5a   : > { %2089 = vsyncadd (%p2508_p4), [#allocation6], 4294966784  ;;  %s1893_s21 = smul.u32 320, %s2298_s16  ;;  %vm212_vm0 = vcmask 130048   ;;  %v194_v0 = vld [vmem:[%s169_s29] sm:$0xff]  ;;  %v195_v1 = vld [vmem:[%s169_s29 + $0x8] sm:$0xff] }
  0x5b   : > { %v196_v2 = vld [vmem:[%s169_s29 + $0x10] sm:$0xff]  ;;  %v2315_v3 = vpack.c.bf16 %v195_v1, %v194_v0  ;;  %v197_v4 = vld [vmem:[%s169_s29 + $0x18] sm:$0xff]  ;;  %v2318_v5 = vld [vmem:[#allocation5] sm:$0xff]  ;;  %s1894_s17 = smul.u32 5120, %s2108_s12  ;;  %s1465_s12 = scalar_lea.sflag [#allocation4], %s2298_s16 }
  0x5c   : > { %s2311_s6 = scalar_lea.vmem [#allocation7], %s1893_s21  ;;  %v2321_v6 = vpack.c.bf16 %v197_v4, %v196_v2  ;;  %1721 = vmatprep.mubr.msk.f32.mxu0 %vm212_vm0, %v2318_v5  ;;  %1728 = vmatprep.mubr.msk.f32.mxu1 %vm212_vm0, %v2318_v5  ;;  %v198_v7 = vld [vmem:[%s169_s29 + $0x20] sm:$0xff]  ;;  %v199_v8 = vld [vmem:[%s169_s29 + $0x28] sm:$0xff]  ;;  %v200_v9 = vld [vmem:[%s169_s29 + $0x30] sm:$0xff]  ;;  %s2122_s15 = smov [#allocation7]  }
  0x5d   : > { %202 = vst [vmem:[%s2311_s6] sm:$0xff] %v194_v0  ;;  %203 = vst [vmem:[%s2311_s6 + $0x8] sm:$0xff] %v195_v1  ;;  %1830 = vmatprep.subr.bf16.mxu0 %v2315_v3  ;;  %v2330_v10 = vpack.c.bf16 %v199_v8, %v198_v7  ;;  %v201_v11 = vld [vmem:[%s169_s29 + $0x38] sm:$0xff]  ;;  %v211_v12 = vld [vmem:[#allocation5 + $0x8] sm:$0xff]  ;;  %s1479_s19 = sshll.u32 %s2311_s6, 4  ;;  %s2434_s5 = scalar_lea.hbm %s2491_s2, %s1894_s17  ;;  %s2436_s19 = int_to_ptr.vmem [resolvable:$true] %s1479_s19 }
  0x5e   : > { %204 = vst [vmem:[%s2311_s6 + $0x10] sm:$0xff] %v196_v2  ;;  %205 = vst [vmem:[%s2311_s6 + $0x18] sm:$0xff] %v197_v4  ;;  %1834 = vmatprep.subr.bf16.mxu1 %v2321_v6  ;;  %1832 = vmatpush3.bf16.msra.mxu0 %v2315_v3  ;;  %v1841_v13 = vpack.c.bf16 %v201_v11, %v200_v9  ;;  %v2367_v26 = vld [vmem:[#allocation5 + $0x10] sm:$0xff]  ;;  %v2373_v27 = vld [vmem:[#allocation5 + $0x18] sm:$0xff]  ;;  %s2030_s8 = scalar_lea.vmem %s2436_s19, 5120  ;;  %s2034_s30 = sshll.u32 %s2122_s15, 4  ;;  %s2035_s30 = int_to_ptr.vmem [resolvable:$false] %s2034_s30 }
  0x5f   : > { %206 = vst [vmem:[%s2311_s6 + $0x20] sm:$0xff] %v198_v7  ;;  %207 = vst [vmem:[%s2311_s6 + $0x28] sm:$0xff] %v199_v8  ;;  %1836 = vmatpush3.bf16.msra.mxu1 %v2321_v6  ;;  %1838 = vmatprep.subr.bf16.mxu0 %v2330_v10  ;;  %p2031_p13 = scmp.ne.s32.totalorder %s2436_s19, %s2030_s8  ;;  %s2036_s23 = scalar_lea.vmem %s2035_s30, 10240 }
  0x60   : > { %208 = vst [vmem:[%s2311_s6 + $0x30] sm:$0xff] %v200_v9  ;;  %209 = vst [vmem:[%s2311_s6 + $0x38] sm:$0xff] %v201_v11  ;;  %1842 = vmatprep.subr.bf16.mxu1 %v1841_v13  ;;  %p2037_p12 = scmp.lt.s32.totalorder %s2436_s19, %s2035_s30  ;;  %p2038_p11 = scmp.lt.s32.totalorder %s2036_s23, %s2030_s8 }
  0x61   : > { %1722 = vmatmul.mubr.msk.f32.vlgmr.msra.gmra.mrb[0].mxu0 %vm212_vm0, %v211_v12  ;;  %p2032_p6 = pnand %p2031_p13, %p2239_p10 }
  0x62   : > { %1729 = vmatmul.mubr.msk.f32.vlgmr.msra.gmra.mrb[0].mxu1 %vm212_vm0, %v211_v12  ;;  %1840 = vmatpush3.bf16.msra.mxu0 %v2330_v10  ;;  %p2039_p0 = por %p2038_p11, %p2037_p12 }
  0x63   : > { %1844 = vmatpush3.bf16.msra.mxu1 %v1841_v13  ;;  %1735 = vmatprep.mubr.msk.f32.mxu0 %vm212_vm0, %v2318_v5  ;;  %p2033_p8 = pneg %p2032_p6 }
  0x64   : > { %1742 = vmatprep.mubr.msk.f32.mxu1 %vm212_vm0, %v2318_v5 }
  0x65   : > { %1736 = vmatmul.mubr.msk.f32.vlgmr.msra.gmra.mrb[2].mxu0 %vm212_vm0, %v211_v12  ;;  %p2040_p5 = pnand %p2039_p0, %p2033_p8 }
  0x66   : > { %1743 = vmatmul.mubr.msk.f32.vlgmr.msra.gmra.mrb[2].mxu1 %vm212_vm0, %v211_v12  ;;  %1749 = vmatprep.mubr.msk.f32.mxu0 %vm212_vm0, %v2318_v5 }
  0x67   : > { %1756 = vmatprep.mubr.msk.f32.mxu1 %vm212_vm0, %v2318_v5 }
 0x134   : > { %v1723_v14 = vpop.f32.mrb[0].mxu0 }
 0x135   : > { %1594 = vst [vmem:[%s2311_s6 + $0x48] sm:$0xff] %v1723_v14  ;;  %v1730_v15 = vpop.f32.mrb[0].mxu1  ;;  %v285_v16 = vpop.f32.mrb[1].mxu0 }
 0x136   : > { %1596 = vst [vmem:[%s2311_s6 + $0x58] sm:$0xff] %v1730_v15  ;;  %1593 = vst [vmem:[%s2311_s6 + $0x40] sm:$0xff] %v285_v16  ;;  %v1845_v17 = vpack.c.bf16 %v1723_v14, %v285_v16  ;;  %v360_v18 = vpop.f32.mrb[1].mxu1 }
 0x137   : > { %1595 = vst [vmem:[%s2311_s6 + $0x50] sm:$0xff] %v360_v18  ;;  %v1849_v19 = vpack.c.bf16 %v1730_v15, %v360_v18 }
 0x138   : > { %v1737_v20 = vpop.f32.mrb[2].mxu0  ;;  %1846 = vmatprep.subr.bf16.mxu0 %v1845_v17 }
 0x139   : > { %1598 = vst [vmem:[%s2311_s6 + $0x68] sm:$0xff] %v1737_v20  ;;  %v1744_v21 = vpop.f32.mrb[2].mxu1  ;;  %1850 = vmatprep.subr.bf16.mxu1 %v1849_v19  ;;  %v435_v22 = vpop.f32.mrb[3].mxu0  ;;  %1848 = vmatpush3.bf16.msra.mxu0 %v1845_v17 }
 0x13a   : > { %1600 = vst [vmem:[%s2311_s6 + $0x78] sm:$0xff] %v1744_v21  ;;  %1597 = vst [vmem:[%s2311_s6 + $0x60] sm:$0xff] %v435_v22  ;;  %v1853_v23 = vpack.c.bf16 %v1737_v20, %v435_v22  ;;  %v510_v24 = vpop.f32.mrb[3].mxu1  ;;  %1852 = vmatpush3.bf16.msra.mxu1 %v1849_v19 }
 0x13b   : > { %1599 = vst [vmem:[%s2311_s6 + $0x70] sm:$0xff] %v510_v24  ;;  %v1857_v25 = vpack.c.bf16 %v1744_v21, %v510_v24 }
 0x13c   : > { %1750 = vmatmul.mubr.msk.f32.vlgmr.msra.gmra.mrb[4].mxu0 %vm212_vm0, %v211_v12  ;;  %1854 = vmatprep.subr.bf16.mxu0 %v1853_v23 }
 0x13d   : > { %1757 = vmatmul.mubr.msk.f32.vlgmr.msra.gmra.mrb[4].mxu1 %vm212_vm0, %v211_v12  ;;  %1858 = vmatprep.subr.bf16.mxu1 %v1857_v25 }
 0x13e   : > { %1856 = vmatpush3.bf16.msra.mxu0 %v1853_v23  ;;  %1860 = vmatpush3.bf16.msra.mxu1 %v1857_v25 }
 0x13f   : > { %1763 = vmatprep.mubr.msk.f32.mxu0 %vm212_vm0, %v2318_v5  ;;  %1770 = vmatprep.mubr.msk.f32.mxu1 %vm212_vm0, %v2318_v5 }
 0x140   : > { %1862 = vmatprep.subr.bf16.mxu0 %v2315_v3  ;;  %1866 = vmatprep.subr.bf16.mxu1 %v2321_v6 }
 0x141   : > { %1764 = vmatmul.mubr.msk.f32.vlgmr.msra.gmra.mrb[6].mxu0 %vm212_vm0, %v211_v12  ;;  %1771 = vmatmul.mubr.msk.f32.vlgmr.msra.gmra.mrb[6].mxu1 %vm212_vm0, %v211_v12 }
 0x142   : > { %1864 = vmatpush3.bf16.msra.mxu0 %v2315_v3  ;;  %1868 = vmatpush3.bf16.msra.mxu1 %v2321_v6 }
 0x143   : > { %1777 = vmatprep.mubr.msk.f32.mxu0 %vm212_vm0, %v2367_v26  ;;  %1784 = vmatprep.mubr.msk.f32.mxu1 %vm212_vm0, %v2367_v26 }
 0x144   : > { %1870 = vmatprep.subr.bf16.mxu0 %v2330_v10  ;;  %1874 = vmatprep.subr.bf16.mxu1 %v1841_v13 }
 0x145   : > { %1778 = vmatmul.mubr.msk.f32.vlgmr.msra.gmra.mrb[8].mxu0 %vm212_vm0, %v2373_v27  ;;  %1785 = vmatmul.mubr.msk.f32.vlgmr.msra.gmra.mrb[8].mxu1 %vm212_vm0, %v2373_v27 }
 0x146   : > { %1872 = vmatpush3.bf16.msra.mxu0 %v2330_v10  ;;  %1876 = vmatpush3.bf16.msra.mxu1 %v1841_v13 }
 0x147   : > { %1791 = vmatprep.mubr.msk.f32.mxu0 %vm212_vm0, %v2367_v26  ;;  %1798 = vmatprep.mubr.msk.f32.mxu1 %vm212_vm0, %v2367_v26 }
 0x149   : > { %1792 = vmatmul.mubr.msk.f32.vlgmr.msra.gmra.mrb[10].mxu0 %vm212_vm0, %v2373_v27  ;;  %1799 = vmatmul.mubr.msk.f32.vlgmr.msra.gmra.mrb[10].mxu1 %vm212_vm0, %v2373_v27 }
 0x14a   : > { %1805 = vmatprep.mubr.msk.f32.mxu0 %vm212_vm0, %v2367_v26  ;;  %1812 = vmatprep.mubr.msk.f32.mxu1 %vm212_vm0, %v2367_v26 }
 0x20f   : > { %v1751_v28 = vpop.f32.mrb[4].mxu0 }
 0x210   : > { %1610 = vst [vmem:[%s2311_s6 + $0x88] sm:$0xff] %v1751_v28  ;;  %v1758_v29 = vpop.f32.mrb[4].mxu1  ;;  %v594_v30 = vpop.f32.mrb[5].mxu0 }
 0x211   : > { %1612 = vst [vmem:[%s2311_s6 + $0x98] sm:$0xff] %v1758_v29  ;;  %1609 = vst [vmem:[%s2311_s6 + $0x80] sm:$0xff] %v594_v30  ;;  %v669_v31 = vpop.f32.mrb[5].mxu1 }
 0x212   : > { %1611 = vst [vmem:[%s2311_s6 + $0x90] sm:$0xff] %v669_v31 }
 0x214   : > { %v1765_v32 = vpop.f32.mrb[6].mxu0  ;;  %v1772_v33 = vpop.f32.mrb[6].mxu1 }
 0x215   : > { %1614 = vst [vmem:[%s2311_s6 + $0xa8] sm:$0xff] %v1765_v32  ;;  %1616 = vst [vmem:[%s2311_s6 + $0xb8] sm:$0xff] %v1772_v33  ;;  %v744_v34 = vpop.f32.mrb[7].mxu0  ;;  %v819_v35 = vpop.f32.mrb[7].mxu1 }
 0x216   : > { %1613 = vst [vmem:[%s2311_s6 + $0xa0] sm:$0xff] %v744_v34  ;;  %1615 = vst [vmem:[%s2311_s6 + $0xb0] sm:$0xff] %v819_v35 }
 0x218   : > { %v1779_v36 = vpop.f32.mrb[8].mxu0  ;;  %v1786_v37 = vpop.f32.mrb[8].mxu1 }
 0x219   : > { %1626 = vst [vmem:[%s2311_s6 + $0xc8] sm:$0xff] %v1779_v36  ;;  %1628 = vst [vmem:[%s2311_s6 + $0xd8] sm:$0xff] %v1786_v37  ;;  %v912_v38 = vpop.f32.mrb[9].mxu0  ;;  %v987_v39 = vpop.f32.mrb[9].mxu1 }
 0x21a   : > { %1625 = vst [vmem:[%s2311_s6 + $0xc0] sm:$0xff] %v912_v38  ;;  %v1877_v40 = vpack.c.bf16 %v1779_v36, %v912_v38  ;;  %1627 = vst [vmem:[%s2311_s6 + $0xd0] sm:$0xff] %v987_v39  ;;  %v1881_v41 = vpack.c.bf16 %v1786_v37, %v987_v39 }
 0x21c   : > { %v1793_v42 = vpop.f32.mrb[10].mxu0  ;;  %v1800_v43 = vpop.f32.mrb[10].mxu1  ;;  %1878 = vmatprep.subr.bf16.mxu0 %v1877_v40  ;;  %1882 = vmatprep.subr.bf16.mxu1 %v1881_v41 }
 0x21d   : > { %1630 = vst [vmem:[%s2311_s6 + $0xe8] sm:$0xff] %v1793_v42  ;;  %1632 = vst [vmem:[%s2311_s6 + $0xf8] sm:$0xff] %v1800_v43  ;;  %v1062_v44 = vpop.f32.mrb[11].mxu0  ;;  %v1137_v45 = vpop.f32.mrb[11].mxu1  ;;  %1880 = vmatpush3.bf16.msra.mxu0 %v1877_v40  ;;  %1884 = vmatpush3.bf16.msra.mxu1 %v1881_v41 }
 0x21e   : > { %1629 = vst [vmem:[%s2311_s6 + $0xe0] sm:$0xff] %v1062_v44  ;;  %v1885_v46 = vpack.c.bf16 %v1793_v42, %v1062_v44  ;;  %1631 = vst [vmem:[%s2311_s6 + $0xf0] sm:$0xff] %v1137_v45  ;;  %v1889_v47 = vpack.c.bf16 %v1800_v43, %v1137_v45 }
 0x220   : > { %1806 = vmatmul.mubr.msk.f32.vlgmr.msra.gmra.mrb[12].mxu0 %vm212_vm0, %v2373_v27  ;;  %1813 = vmatmul.mubr.msk.f32.vlgmr.msra.gmra.mrb[12].mxu1 %vm212_vm0, %v2373_v27 }
 0x221   : > { %1886 = vmatprep.subr.bf16.mxu0 %v1885_v46  ;;  %1890 = vmatprep.subr.bf16.mxu1 %v1889_v47 }
 0x222   : > { %1888 = vmatpush3.bf16.msra.mxu0 %v1885_v46  ;;  %1892 = vmatpush3.bf16.msra.mxu1 %v1889_v47 }
 0x223   : > { %1819 = vmatprep.mubr.msk.f32.mxu0 %vm212_vm0, %v2367_v26  ;;  %1826 = vmatprep.mubr.msk.f32.mxu1 %vm212_vm0, %v2367_v26 }
 0x225   : > { %1820 = vmatmul.mubr.msk.f32.vlgmr.msra.gmra.mrb[14].mxu0 %vm212_vm0, %v2373_v27  ;;  %1827 = vmatmul.mubr.msk.f32.vlgmr.msra.gmra.mrb[14].mxu1 %vm212_vm0, %v2373_v27 }
 0x2f3   : > { %v1807_v48 = vpop.f32.mrb[12].mxu0  ;;  %v1814_v49 = vpop.f32.mrb[12].mxu1 }
 0x2f4   : > { %1642 = vst [vmem:[%s2311_s6 + $0x108] sm:$0xff] %v1807_v48  ;;  %1644 = vst [vmem:[%s2311_s6 + $0x118] sm:$0xff] %v1814_v49  ;;  %v1221_v50 = vpop.f32.mrb[13].mxu0  ;;  %v1296_v51 = vpop.f32.mrb[13].mxu1 }
 0x2f5   : > { %1641 = vst [vmem:[%s2311_s6 + $0x100] sm:$0xff] %v1221_v50  ;;  %1643 = vst [vmem:[%s2311_s6 + $0x110] sm:$0xff] %v1296_v51 }
 0x2f8   : > { %v1821_v52 = vpop.f32.mrb[14].mxu0  ;;  %v1828_v53 = vpop.f32.mrb[14].mxu1 }
 0x2f9   : > { %1646 = vst [vmem:[%s2311_s6 + $0x128] sm:$0xff] %v1821_v52  ;;  %1648 = vst [vmem:[%s2311_s6 + $0x138] sm:$0xff] %v1828_v53  ;;  %v1371_v54 = vpop.f32.mrb[15].mxu0  ;;  %v1446_v55 = vpop.f32.mrb[15].mxu1 }
 0x2fa   : > { %1645 = vst [vmem:[%s2311_s6 + $0x120] sm:$0xff] %v1371_v54  ;;  %1647 = vst [vmem:[%s2311_s6 + $0x130] sm:$0xff] %v1446_v55 }
 0x2fb   : > { %2043 = shalt.err (!%p2040_p5)
}
 0x2fc   : > { %s2044_s3 = scalar_lea.hbm %s2434_s5, 5120  ;;  %s2048_s27 = scalar_lea.hbm %s2491_s2, 10240 }
 0x2fd   : > { %p2045_p9 = scmp.ne.s32.totalorder %s2434_s5, %s2044_s3  ;;  %p2049_p3 = scmp.lt.u32.totalorder %s2434_s5, %s2491_s2 }
 0x2fe   : > { %p2050_p7 = scmp.lt.u32.totalorder %s2048_s27, %s2044_s3  ;;  %p2052_p13 = scmp.lt.u32.totalorder %s2044_s3, %s2434_s5 }
 0x2ff   : > { %p2046_p1 = pnand %p2045_p9, %p2239_p10 }
 0x300   : > { %p2051_p4 = por %p2050_p7, %p2049_p3 }
 0x301   : > { %p2047_p2 = pneg %p2046_p1 }
 0x302   : > { %p2053_p6 = por %p2052_p13, %p2051_p4 }
 0x304   : > { %p2054_p8 = pnand %p2053_p6, %p2047_p2 }
 0x306   : > { %2057 = shalt.err (!%p2054_p8)
}
 0x307   : > { %s2123_s21 = smov 128   ;;  %s2124_s6 = smov 8  }
 0x308   : > { %1901 = dma.vmem_to_hbm [thread:$0]  (%p2239_p10), %s2436_s19, 5120, %s2434_s5, %s1465_s12, %s2123_s21, %s2123_s21, %s2124_s6  }
 0x309 PF: > { %s1494_s17 = sand.u32 1, %s2096_s9   ;;  %p2509_p12 = scmp.ne.s32.totalorder %s2499_s20, 0 }
 0x30a   : > { %p2510_p11 = scmp.ge.s32.totalorder %s2116_s14, 2  ;;  %s1495_s7 = scalar_lea.sflag [#allocation4], %s1494_s17 }
 0x30c   : > { %p1912_p0 = pnand %p2510_p11, %p2509_p12 }
 0x30e   : > { %2091 = dma.done.wait (!%p1912_p0), %s1495_s7, 5120  }
 0x30f   : > { %2093 = vsyncadd (!%p1912_p0), %s1495_s7, 4294962176  ;;  %s19_s14 = sadd.s32 1, %s2116_s14   ;;  %s2511_s9 = smov %s2100_s10 }
 0x310   : > { %p16_p5 = scmp.ge.s32.totalorder %s19_s14, 4   ;;  %s2512_s10 = smov %s2104_s11 }
 0x311   : > { %s2513_s11 = smov %s2248_s28  ;;  %s2514_s12 = smov %s2112_s13 }
 0x312   : > { %s2515_s13 = smov %s2517_s25  ;;  %18 = sbr.rel (!%p16_p5) target bundleno = 7 (0x7), region = 82 }
 0x319   :  { %1500 = vsyncpa [#allocation3], 1 }
 0x31a   :  { %1502 = vsyncpa [#allocation3 + $0x1], 1 }
 0x31b   :  { %1503 = vsyncpa [#allocation6], 1 }
 0x31c   :  { %1504 = vsyncpa [#allocation4], 1 }
 0x31d   :  { %1506 = vsyncpa [#allocation4 + $0x1], 1 }

</bundles_post_ra>
